<compile_context>
chip_gen: v7x
topology: tpu7x:2x2x1
jax: 0.10.0
libtpu: 0.0.40
codegen_flags: <defaults>
</compile_context>

<pallas_src>
import functools

import jax
import jax.numpy as jnp
from jax.experimental import pallas as pl
from jax.experimental.pallas import tpu as pltpu


# ---------------------------------------------------------------------------
# Kernel
# ---------------------------------------------------------------------------
def _masked_avg_kernel(num_hidden, native_pre_add, mask_ref, inv_ref, *refs):
    """Masked mean over the sequence axis for one (batch, hidden) tile.

    mask_ref          : (ts, tb)   f32  seq-first mask tile (lane-dense)
    inv_ref           : (tb, 1)    f32  1 / (num_hidden * mask.sum(seq))
    refs[:num_hidden] : (ts, tb, th)    hidden-state tiles (native dtype)
    refs[num_hidden]  : (tb, th)        output tile
    refs[num_hidden+1]: (tb, th)   f32  VMEM accumulator scratch
    """
    hidden_refs = refs[:num_hidden]
    o_ref = refs[num_hidden]
    acc_ref = refs[num_hidden + 1]

    s = pl.program_id(2)  # sequence (reduction) axis is the last grid axis

    @pl.when(s == 0)
    def _init():
        acc_ref[...] = jnp.zeros_like(acc_ref)

    # Combine layers. The 1/num_hidden scale is folded into inv_ref (wrapper),
    # so the per-step loop is adds only.
    if num_hidden == 1:
        x = hidden_refs[0][...].astype(jnp.float32)
    elif native_pre_add:
        # bf16 VPU add (v6e/v7x), single upcast afterwards.
        x = hidden_refs[0][...]
        for r in hidden_refs[1:]:
            x = x + r[...]
        x = x.astype(jnp.float32)
    else:
        x = hidden_refs[0][...].astype(jnp.float32)
        for r in hidden_refs[1:]:
            x = x + r[...].astype(jnp.float32)

    m = mask_ref[...]                                    # (ts, tb) f32
    acc_ref[...] += jnp.sum(x * m[:, :, None], axis=0)   # (tb, th) numerator

    @pl.when(s == pl.num_programs(2) - 1)
    def _finalize():
        # inv_ref already holds 1/(num_hidden * count): one broadcast multiply.
        o_ref[...] = (acc_ref[...] * inv_ref[...]).astype(o_ref.dtype)


# ---------------------------------------------------------------------------
# Tile selection
# ---------------------------------------------------------------------------
def _vmem_budget_bytes():
    try:
        cap = int(pltpu.get_tpu_info().vmem_capacity_bytes)
    except Exception:
        cap = 64 * 1024 * 1024  # conservative default (v7x per-core VMEM)
    # ~75% of physical: <=48 MiB on v7x (64 MiB), <=96 MiB on v5e/v6e (128 MiB).
    return (cap * 3) // 4


def _candidates(n, mult, cap):
    """Divisors of n that are multiples of `mult` (plus n itself, always legal)."""
    out = {n}
    t = mult
    while t <= min(n, cap):
        if n % t == 0:
            out.add(t)
        t += mult
    return sorted(out, reverse=True)


def _pick_tb(B, cap=512):
    # The 2-D mask block (ts, tb) puts tb on lanes: tb must be a multiple of 128
    # or equal to B. 128 is also a multiple of every sublane pack (8/16/32).
    best = None
    t = 128
    while t <= min(B, cap):
        if B % t == 0:
            best = t
        t += 128
    return best if best is not None else B


# ---------------------------------------------------------------------------
# Wrapper
# ---------------------------------------------------------------------------
def masked_avg_pool(hiddens, attention_mask, *, block_b=None, block_s=None,
                    block_h=None, native_pre_add=None):
    """hiddens: list of [S, B, H] (seq-first) arrays; attention_mask: [B, S].

    Returns [B, H] = sum_s(mean(hiddens)[s,b,:] * mask[b,s]) / sum_s(mask[b,s]).
    """
    S, B, H = hiddens[0].shape
    dtype = hiddens[0].dtype
    num_hidden = len(hiddens)
    isz = jnp.dtype(dtype).itemsize
    osz = isz

    budget = _vmem_budget_bytes()
    tb = block_b if block_b is not None else _pick_tb(B)

    def vmem_bytes(ts, th):
        hid = 2 * num_hidden * ts * tb * th * isz  # double-buffered hidden tiles
        msk = 2 * ts * tb * 4                      # lane-dense mask tile
        inv = 2 * tb * 128 * 4                     # (tb,1) padded to 128 lanes (tiny)
        out = 2 * tb * th * osz
        acc = tb * th * 4
        return hid + msk + inv + out + acc

    ts_cands = [block_s] if block_s is not None else _candidates(S, 8, 1024)
    th_cands = [block_h] if block_h is not None else _candidates(H, 128, 1024)
    fitting = [(a, b) for a in ts_cands for b in th_cands
               if vmem_bytes(a, b) <= budget]
    if not fitting:
        fitting = [(min(ts_cands), min(th_cands))]
    # Keep per-hidden-stream DMA in the ~1-4 MiB sweet spot when possible.
    under = [p for p in fitting if p[0] * tb * p[1] * isz <= (4 << 20)]
    if under:
        ts, th = max(under, key=lambda p: p[0] * p[1])
    else:
        ts, th = min(fitting, key=lambda p: p[0] * p[1])

    assert B % tb == 0 and S % ts == 0 and H % th == 0, \
        ("tile sizes must divide (B, S, H)", (tb, ts, th), (B, S, H))

    if native_pre_add is None:
        # bf16 VALU exists on v6e/v7x; on v5e the compiler emulates (correct,
        # just not a win) - pass native_pre_add=False there explicitly.
        native_pre_add = (num_hidden > 1
                          and jnp.dtype(dtype) == jnp.dtype(jnp.bfloat16))

    # Tiny wrapper-side relayouts only; the big [S,B,H] tensors are untouched.
    mask_f32 = attention_mask.astype(jnp.float32)                    # [B, S]
    mask_sb = mask_f32.T                                             # [S, B]
    inv_denom = (1.0 / (num_hidden * mask_f32.sum(-1)))[:, None]     # [B, 1] f32

    grid = (B // tb, H // th, S // ts)
    in_specs = (
        [pl.BlockSpec((ts, tb), lambda b, h, s: (s, b)),
         pl.BlockSpec((tb, 1), lambda b, h, s: (b, 0))]
        + [pl.BlockSpec((ts, tb, th), lambda b, h, s: (s, b, h))] * num_hidden
    )
    out_specs = pl.BlockSpec((tb, th), lambda b, h, s: (b, h))

    est_use = vmem_bytes(ts, th)
    vmem_limit = min(max(budget, est_use + (2 << 20)), 128 * 1024 * 1024)

    cost = pl.CostEstimate(
        flops=(num_hidden + 1) * S * B * H,
        transcendentals=0,
        bytes_accessed=(num_hidden * S * B * H * isz + S * B * 4 + B * 4
                        + B * H * osz),
    )

    return pl.pallas_call(
        functools.partial(_masked_avg_kernel, num_hidden, native_pre_add),
        out_shape=jax.ShapeDtypeStruct((B, H), dtype),
        grid_spec=pltpu.PrefetchScalarGridSpec(
            num_scalar_prefetch=0,
            grid=grid,
            in_specs=in_specs,
            out_specs=out_specs,
            scratch_shapes=[pltpu.VMEM((tb, th), jnp.float32)],
        ),
        compiler_params=pltpu.CompilerParams(
            # batch & hidden axes can shard across v7x's 2 TCs; seq is the reduction.
            dimension_semantics=("parallel", "parallel", "arbitrary"),
            vmem_limit_bytes=vmem_limit,
        ),
        cost_estimate=cost,
    )(mask_sb, inv_denom, *hiddens)


def pooler(pooler_type, attention_mask, hidden_states, tensor_style="batch_first",
           block_b=None, block_s=None, block_h=None):
    """Forward of the PyTorch Pooler.

    hidden_states: tuple of [S, B, H] arrays (model-native seq-first layout,
                   i.e. before the `.transpose(0, 1)` in the PyTorch code).
    attention_mask: [B, S].
    """
    assert pooler_type in (
        "cls", "cls_before_pooler", "avg", "avg_top2", "avg_first_last"
    ), "unrecognized pooling type %s" % pooler_type

    last_hidden = hidden_states[-1]                      # [S, B, H]

    if pooler_type in ("cls", "cls_before_pooler"):
        # Pure slice: a pallas_call here would be launch + DMA overhead only.
        if tensor_style != "batch_first":
            return last_hidden[:, -1]                    # [S, H]
        return last_hidden[-1]                           # [B, H] (last token)
    elif pooler_type == "avg":
        return masked_avg_pool([last_hidden], attention_mask,
                               block_b=block_b, block_s=block_s, block_h=block_h)
    elif pooler_type == "avg_first_last":
        # Matches the PyTorch source: first_hidden = hidden_states[1].
        return masked_avg_pool([hidden_states[1], last_hidden], attention_mask,
                               block_b=block_b, block_s=block_s, block_h=block_h)
    elif pooler_type == "avg_top2":
        return masked_avg_pool([hidden_states[-2], last_hidden], attention_mask,
                               block_b=block_b, block_s=block_s, block_h=block_h)
    else:
        raise NotImplementedError


if __name__ == "__main__":
    # Small shapes: seq=16, batch=8, hidden=256 (2 lane-dense H blocks), 4 layers.
    S, B, H = 16, 8, 256
    n_layers = 4

    key = jax.random.PRNGKey(0)
    keys = jax.random.split(key, n_layers + 1)
    hidden_states = tuple(
        jax.random.normal(keys[i], (S, B, H), dtype=jnp.float32)
        for i in range(n_layers)
    )
    # Random 0/1 attention mask with at least one valid token per row.
    attention_mask = (jax.random.uniform(keys[-1], (B, S)) > 0.3).astype(jnp.float32)
    attention_mask = attention_mask.at[:, 0].set(1.0)

    # Pure-JAX references mirroring the PyTorch math (batch-first).
    def to_bf(x):  # [S,B,H] -> [B,S,H]
        return jnp.transpose(x, (1, 0, 2))

    last_bf = to_bf(hidden_states[-1])
    m3 = attention_mask[:, :, None]
    denom = attention_mask.sum(-1)[:, None]
    refs = {
        "cls": last_bf[:, -1],
        "cls_before_pooler": last_bf[:, -1],
        "avg": (last_bf * m3).sum(1) / denom,
        "avg_first_last": (
            ((to_bf(hidden_states[1]) + last_bf) / 2.0) * m3
        ).sum(1) / denom,
        "avg_top2": (
            ((last_bf + to_bf(hidden_states[-2])) / 2.0) * m3
        ).sum(1) / denom,
    }

    # block_s=8, block_h=128 -> grid (1, 2, 2): exercises the pl.when accumulator
    # path over seq and the parallel H axis.
    for ptype in ["cls", "cls_before_pooler", "avg", "avg_first_last", "avg_top2"]:
        out = pooler(ptype, attention_mask, hidden_states, block_s=8, block_h=128)
        out = jax.block_until_ready(out)
        ref = refs[ptype]
        assert out.shape == ref.shape, (ptype, out.shape, ref.shape)
        assert jnp.allclose(out, ref, atol=1e-5, rtol=1e-5), ptype

    # Also exercise the automatic (VMEM-budgeted) tile selection path.
    out = jax.block_until_ready(pooler("avg_top2", attention_mask, hidden_states))
    assert jnp.allclose(out, refs["avg_top2"], atol=1e-5, rtol=1e-5)

    # TODO(synk): rows whose attention mask is all zeros produce inf/NaN, same as
    # the PyTorch reference (division by a zero count).
    print("KERNEL_OK")
</pallas_src>

<mosaic_0001>
module attributes {stable_mosaic.version = 11 : i64} {
  func.func @_masked_avg_kernel(%arg0: i32, %arg1: i32, %arg2: i32, %arg3: memref<8x8xf32, #tpu.memory_space<vmem>>, %arg4: memref<8x1xf32, #tpu.memory_space<vmem>>, %arg5: memref<8x8x128xf32, #tpu.memory_space<vmem>>, %arg6: memref<8x128xf32, #tpu.memory_space<vmem>>, %arg7: memref<8x128xf32, #tpu.memory_space<vmem>>) attributes {dimension_semantics = [#tpu.dimension_semantics<parallel>, #tpu.dimension_semantics<parallel>, #tpu.dimension_semantics<arbitrary>], iteration_bounds = array<i64: 1, 2, 2>, scalar_prefetch = 0 : i64, scratch_operands = 1 : i64, tpu.core_type = #tpu.core_type<tc>, window_params = [{transform_indices = @transform_0, window_bounds = array<i64: 8, 8>}, {transform_indices = @transform_1, window_bounds = array<i64: 8, 1>}, {transform_indices = @transform_2, window_bounds = array<i64: 8, 8, 128>}, {transform_indices = @transform_3, window_bounds = array<i64: 8, 128>}]} {
    %c0_i32 = arith.constant 0 : i32
    %0 = arith.cmpi eq, %arg2, %c0_i32 : i32
    %1 = arith.extui %0 : i1 to i32
    %c0_i32_0 = arith.constant 0 : i32
    %2 = arith.cmpi ne, %1, %c0_i32_0 : i32
    scf.if %2 {
      %cst_10 = arith.constant 0.000000e+00 : f32
      %15 = vector.broadcast %cst_10 : f32 to vector<8x128xf32>
      %c0_11 = arith.constant 0 : index
      %c0_12 = arith.constant 0 : index
      %16 = vector.load %arg7[%c0_11, %c0_12] : memref<8x128xf32, #tpu.memory_space<vmem>>, vector<8x128xf32>
      tpu.vector_store %arg7[%c0_11, %c0_12], %15 {strides = array<i32>} : memref<8x128xf32, #tpu.memory_space<vmem>>, vector<8x128xf32>,
    } else {
    }
    %c0 = arith.constant 0 : index
    %c0_1 = arith.constant 0 : index
    %c0_2 = arith.constant 0 : index
    %3 = vector.load %arg5[%c0, %c0_1, %c0_2] : memref<8x8x128xf32, #tpu.memory_space<vmem>>, vector<8x8x128xf32>
    %c0_3 = arith.constant 0 : index
    %c0_4 = arith.constant 0 : index
    %4 = vector.load %arg3[%c0_3, %c0_4] : memref<8x8xf32, #tpu.memory_space<vmem>>, vector<8x8xf32>
    %c0_5 = arith.constant 0 : index
    %c0_6 = arith.constant 0 : index
    %5 = vector.load %arg7[%c0_5, %c0_6] : memref<8x128xf32, #tpu.memory_space<vmem>>, vector<8x128xf32>
    %6 = vector.shape_cast %4 : vector<8x8xf32> to vector<8x8x1xf32>
    %7 = vector.broadcast %6 : vector<8x8x1xf32> to vector<8x8x128xf32>
    %8 = arith.mulf %3, %7 : vector<8x8x128xf32>
    %cst = arith.constant dense<0.000000e+00> : vector<8x128xf32>
    %9 = vector.multi_reduction <add>, %8, %cst [0] : vector<8x8x128xf32> to vector<8x128xf32>
    %10 = arith.addf %5, %9 : vector<8x128xf32>
    %c0_7 = arith.constant 0 : index
    %c0_8 = arith.constant 0 : index
    %11 = vector.load %arg7[%c0_7, %c0_8] : memref<8x128xf32, #tpu.memory_space<vmem>>, vector<8x128xf32>
    tpu.vector_store %arg7[%c0_7, %c0_8], %10 {strides = array<i32>} : memref<8x128xf32, #tpu.memory_space<vmem>>, vector<8x128xf32>,
    %c1_i32 = arith.constant 1 : i32
    %12 = arith.cmpi eq, %arg2, %c1_i32 : i32
    %13 = arith.extui %12 : i1 to i32
    %c0_i32_9 = arith.constant 0 : i32
    %14 = arith.cmpi ne, %13, %c0_i32_9 : i32
    scf.if %14 {
      %c0_10 = arith.constant 0 : index
      %c0_11 = arith.constant 0 : index
      %15 = vector.load %arg7[%c0_10, %c0_11] : memref<8x128xf32, #tpu.memory_space<vmem>>, vector<8x128xf32>
      %c0_12 = arith.constant 0 : index
      %c0_13 = arith.constant 0 : index
      %16 = vector.load %arg4[%c0_12, %c0_13] : memref<8x1xf32, #tpu.memory_space<vmem>>, vector<8x1xf32>
      %17 = vector.broadcast %16 : vector<8x1xf32> to vector<8x128xf32>
      %18 = arith.mulf %15, %17 : vector<8x128xf32>
      %c0_14 = arith.constant 0 : index
      %c0_15 = arith.constant 0 : index
      %19 = vector.load %arg6[%c0_14, %c0_15] : memref<8x128xf32, #tpu.memory_space<vmem>>, vector<8x128xf32>
      tpu.vector_store %arg6[%c0_14, %c0_15], %18 {strides = array<i32>} : memref<8x128xf32, #tpu.memory_space<vmem>>, vector<8x128xf32>,
    } else {
    }
    return
  }
  func.func @transform_0(%arg0: i32, %arg1: i32, %arg2: i32) -> (i32, i32) {
    %c0_i32 = arith.constant 0 : i32
    return %arg2, %arg0 : i32, i32
  }
  func.func @transform_1(%arg0: i32, %arg1: i32, %arg2: i32) -> (i32, i32) {
    %c0_i32 = arith.constant 0 : i32
    %c0_i32_0 = arith.constant 0 : i32
    return %arg0, %c0_i32 : i32, i32
  }
  func.func @transform_2(%arg0: i32, %arg1: i32, %arg2: i32) -> (i32, i32, i32) {
    %c0_i32 = arith.constant 0 : i32
    return %arg2, %arg0, %arg1 : i32, i32, i32
  }
  func.func @transform_3(%arg0: i32, %arg1: i32, %arg2: i32) -> (i32, i32) {
    %c0_i32 = arith.constant 0 : i32
    return %arg0, %arg1 : i32, i32
  }
}

</mosaic_0001>

<bundles_post_ra>
// kernel: tpu_custom_call.1
= control target key start
LH: loop header
LB: loop body
LE: loop exit
PB: predicated region body
PF: predicated region fallthrough
CT: control target
= control target key end

     0   :  { %8 = vsyncpa [#allocation4], 0  ;;  %s1052_s0 = inlined_call_operand.vmem [shape: f32[16,8], index: 0, kind: input, shape index: {}]   ;;  %s1053_s1 = inlined_call_operand.vmem [shape: f32[8,1], index: 1, kind: input, shape index: {}]   ;;  %s1054_s2 = inlined_call_operand.hbm [shape: f32[16,8,256], index: 2, kind: input, shape index: {}]   ;;  %s1055_s3 = inlined_call_operand.hbm [shape: f32[8,256], index: 3, kind: output, shape index: {}]  }
   0x1   :  { %10 = vsyncpa [#allocation4 + $0x1], 0 }
   0x2   :  { %11 = vsyncpa [#allocation5], 0 }
   0x3   :  { %13 = vsyncpa [#allocation5 + $0x1], 0  ;;  %s810_s12 = smov 0   ;;  %s812_s13 = smov 0  }
   0x4   :  { %s814_s14 = smov 0   ;;  %s816_s15 = smov 0  }
   0x5   :  { %s818_s16 = smov 0   ;;  %s820_s17 = smov 0  }
   0x6   :  { %s822_s18 = smov 0   ;;  %s824_s19 = smov 0  }
   0x7   :  { %s826_s20 = smov 0   ;;  %s828_s21 = smov 0  }
   0x8   :  { %s830_s22 = smov 0  }
   0x9 LB: > { %s501_s23 = sadd.s32 4294967295, %s781_s22   ;;  %s502_s24 = sadd.s32 4294967294, %s781_s22   ;;  %s781_s22 = sphi %s830_s22, %s19_s22   ;;  %s777_s21 = sphi %s828_s21, %s1079_s21   ;;  %s773_s20 = sphi %s826_s20, %s1078_s20   ;;  %s769_s19 = sphi %s824_s19, %s1077_s19   ;;  %s765_s18 = sphi %s822_s18, %s1076_s18   ;;  %s761_s17 = sphi %s820_s17, %s1075_s17   ;;  %s757_s16 = sphi %s818_s16, %s1074_s16   ;;  %s753_s15 = sphi %s816_s15, %s1073_s15   ;;  %s749_s14 = sphi %s814_s14, %s1072_s14   ;;  %s745_s13 = sphi %s812_s13, %s1071_s13   ;;  %s741_s12 = sphi %s810_s12, %s1070_s12  }
   0xa   : > { %s31_s25 = sadd.s32 1, %s773_s20  ;;  %s34_s26 = sadd.s32 1, %s777_s21 }
   0xb   : > { %p32_p0 = scmp.ge.s32.totalorder %s31_s25, 2  ;;  %s103_s27 = sadd.s32 1, %s761_s17 }
   0xc   : > { %p110_p1 = scmp.ne.s32.totalorder %s761_s17, %s757_s16  ;;  %p111_p2 = scmp.eq.s32.totalorder %s781_s22, 0 }
   0xd   : > { %s1081_s25 = smov (%p32_p0, %s31_s25), 0  ;;  %s1083_s26 = smov (!%p32_p0, %s34_s26), %s777_s21 }
   0xe   : > { %1059 = sst [smem:[#allocation9_spill]] %s1081_s25  ;;  %s96_s28 = ssub.s32 %s773_s20, %s1081_s25 }
   0xf   : > { %p876_p3 = por %p111_p2, %p110_p1  ;;  %p36_p4 = scmp.ge.s32.totalorder %s1083_s26, 2 }
  0x10   : > { %p116_p5 = scmp.ne.s32.totalorder %s757_s16, %s753_s15  ;;  %p117_p6 = scmp.eq.s32.totalorder %s501_s23, 0 }
  0x11   : > { %s131_s30 = sadd.s32 1, %s749_s14  ;;  %s1085_s26 = smov (%p36_p4, %s1083_s26), 0 }
  0x12   : > { %1061 = sst [smem:[#allocation10_spill]] %s1085_s26  ;;  %p884_p7 = por %p117_p6, %p116_p5 }
  0x13   : > { %p141_p8 = scmp.ne.s32.totalorder %s749_s14, %s745_s13  ;;  %s99_s5 = ssub.s32 %s777_s21, %s1085_s26 }
  0x14   : > { %p142_p9 = scmp.eq.s32.totalorder %s501_s23, 3  ;;  %s100_s6 = sor.u32 %s99_s5, %s96_s28 }
  0x15   : > { %p129_p10 = scmp.eq.s32.totalorder %s99_s5, 0  ;;  %p101_p11 = scmp.eq.s32.totalorder %s100_s6, 0 }
  0x16   : > { %p892_p12 = por %p142_p9, %p141_p8  ;;  %p147_p13 = scmp.ne.s32.totalorder %s745_s13, %s741_s12 }
  0x17   : > { %s897_s8 = scalar_select %p129_p10, %s749_s14, %s131_s30  }
  0x18   : > { %s1063_s7 = scalar_select %p892_p12, 1, 0 }
  0x19   : > { %s900_s9 = scalar_select %p101_p11, %s761_s17, %s103_s27  }
  0x1a   : > { %p148_p0 = scmp.eq.s32.totalorder %s502_s24, 3  ;;  %p533_p1 = scmp.lt.s32.totalorder %s781_s22, 4 }
  0x1b   : > { %s185_s11 = sand.u32 1, %s761_s17   ;;  %s520_s23 = sshll.u32 %s773_s20, 4 }
  0x1c   : > { %p905_p2 = por %p148_p0, %p147_p13  ;;  %s506_s15 = sshll.u32 %s185_s11, 6 }
  0x1d   : > { %s197_s28 = sadd.s32 %s777_s21, %s520_s23  ;;  %s189_s5 = scalar_lea.vmem [#allocation3], %s506_s15 }
  0x1e   : > { %s1064_s10 = scalar_select %p905_p2, 1, 0 }
  0x1f   : > { %s200_s6 = sshll.u32 %s189_s5, 4  ;;  %s509_s26 = sshll.u32 %s197_s28, 7  ;;  %s912_s6 = int_to_ptr.vmem [resolvable:$true] %s200_s6 }
  0x20   : > { %s917_s27 = scalar_lea.hbm %s1054_s2, %s509_s26  ;;  %p921_p4 = pnand %p533_p1, %p876_p3 }
  0x21   : > { %s925_s15 = scalar_lea.sflag [#allocation4], %s185_s11  ;;  %s629_s23 = scalar_lea.hbm %s917_s27, 1024 }
  0x22   : > { %p630_p5 = scmp.ne.s32.totalorder %s917_s27, %s629_s23  ;;  %p631_p6 = pneg %p921_p4 }
  0x23   : > { %s634_s29 = scalar_lea.hbm %s1054_s2, 4096  ;;  %p635_p3 = scmp.lt.u32.totalorder %s917_s27, %s1054_s2 }
  0x24   : > { %p632_p8 = pnand %p631_p6, %p630_p5  ;;  %p636_p10 = scmp.lt.u32.totalorder %s634_s29, %s629_s23 }
  0x25   : > { %p638_p13 = scmp.lt.u32.totalorder %s629_s23, %s917_s27 }
  0x26   : > { %p633_p9 = pneg %p632_p8  ;;  %p637_p11 = por %p636_p10, %p635_p3 }
  0x28   : > { %p639_p0 = por %p638_p13, %p637_p11 }
  0x2a   : > { %p640_p1 = pnand %p639_p0, %p633_p9 }
  0x2c   : > { %643 = shalt.err (!%p640_p1)
}
  0x2d   : > { %s644_s11 = scalar_lea.vmem %s912_s6, 1024  ;;  %s783_s30 = smov [#allocation3]  }
  0x2e   : > { %p645_p5 = scmp.ne.s32.totalorder %s912_s6, %s644_s11  ;;  %s649_s25 = sshll.u32 %s783_s30, 4  ;;  %s650_s25 = int_to_ptr.vmem [resolvable:$false] %s649_s25 }
  0x2f   : > { %s651_s26 = scalar_lea.vmem %s650_s25, 2048  ;;  %p652_p12 = scmp.lt.s32.totalorder %s912_s6, %s650_s25 }
  0x30   : > { %p647_p8 = pnand %p645_p5, %p631_p6  ;;  %p653_p3 = scmp.lt.s32.totalorder %s651_s26, %s644_s11 }
  0x32   : > { %p648_p2 = pneg %p647_p8  ;;  %p654_p10 = por %p653_p3, %p652_p12 }
  0x34   : > { %p655_p11 = pnand %p654_p10, %p648_p2 }
  0x36   : > { %658 = shalt.err (!%p655_p11)
}
  0x37   : > { %s784_s23 = smov 256   ;;  %s785_s29 = smov 128  }
  0x38   : > { %s786_s28 = smov 8   ;;  %p510_p6 = scmp.ge.s32.totalorder %s781_s22, 1 }
  0x39   : > { %528 = dma.hbm_to_vmem [thread:$0]  (!%p921_p4), %s917_s27, 1024, %s912_s6, %s925_s15, %s784_s23, %s785_s29, %s786_s28  }
  0x3a   : > { %p208_p9 = scmp.lt.s32.totalorder %s781_s22, 5 }
  0x3c   : > { %p209_p13 = pnand %p510_p6, %p208_p9 }
  0x3d   : > { %s214_s5 = sand.u32 (!%p209_p13), 1, %s757_s16  }
  0x3e   : > { %212 = sbr.rel (%p209_p13) target bundleno = 261 (0x105), region = 32  ;;  %s511_s11 = sshll.u32 (!%p209_p13), %s214_s5, 6 }
  0x3f   : > { %s215_s30 = scalar_lea.sflag (!%p209_p13), [#allocation4], %s214_s5  ;;  %s956_s25 = scalar_lea.vmem (!%p209_p13), [#allocation3], %s511_s11 }
  0x45   : > { %732 = dma.done.wait (%p884_p7), %s215_s30, 1024  }
  0x46   : > { %734 = vsyncadd (%p884_p7), %s215_s30, 4294966272  ;;  %s249_s6 = sand.u32 1, %s745_s13   ;;  %p252_p12 = scmp.lt.s32.totalorder %s765_s18, 1 }
  0x47   : > { %s966_s27 = sshll.u32 %s249_s6, 3  ;;  %p514_p2 = scmp.ne.s32.totalorder %s765_s18, 0 }
  0x48   : > { %s253_s24 = scalar_select %p252_p12, %s765_s18, 1 }
  0x49   : > { %s251_s28 = scalar_lea.vmem [#allocation6], %s966_s27  ;;  %267 = sbr.rel (%p514_p2) target bundleno = 80 (0x50), region = 40  ;;  %v787_v0 = vmov (!%p514_p2), 0.0  }
  0x4a   : > { %s513_s15 = sshll.u32 %s253_s24, 3  ;;  %268 = vst [vmem:[#allocation2] sm:$0xff] (!%p514_p2), %v787_v0 }
  0x4b   : > { %s258_s29 = scalar_lea.vmem %s1052_s0, %s513_s15 }
  0x50 PF: > { %v279_v1 = vlaneseq  ;;  %v277_v3 = vld [vmem:[%s258_s29] sm:$0xff]  ;;  %v269_v22 = vld [vmem:[%s956_s25] sm:$0xff]  ;;  %v270_v23 = vld [vmem:[%s956_s25 + $0x8] sm:$0xff]  ;;  %p515_p7 = scmp.ne.s32.totalorder %s765_s18, 1 }
  0x51   : > { %v271_v24 = vld [vmem:[%s956_s25 + $0x10] sm:$0xff]  ;;  %v272_v27 = vld [vmem:[%s956_s25 + $0x18] sm:$0xff]  ;;  %v273_v30 = vld [vmem:[%s956_s25 + $0x20] sm:$0xff]  ;;  %v788_v54 = vmov (!%p515_p7), 0  }
  0x52   : > { %v280_v2 = vshrl.u32 %v279_v1, 7  ;;  %v274_v36 = vld [vmem:[%s956_s25 + $0x28] sm:$0xff]  ;;  %v275_v39 = vld [vmem:[%s956_s25 + $0x30] sm:$0xff]  ;;  %v276_v44 = vld [vmem:[%s956_s25 + $0x38] sm:$0xff]  ;;  %628 = vset.pattern.permute.xlu0 (!%p515_p7), %v788_v54 }
  0x53   : > { %v278_v50 = vld [vmem:[#allocation2] sm:$0xff] }
  0x54   : > { %v281_v4 = vsub.s32 0, %v280_v2  ;;  %v295_v5 = vsub.s32 2, %v280_v2  ;;  %v288_v6 = vsub.s32 1, %v280_v2  ;;  %v302_v7 = vsub.s32 3, %v280_v2  ;;  %v357_v53 = vld [vmem:[%s1053_s1] sm:$0xff] (!%p515_p7) }
  0x55   : > { %v309_v12 = vsub.s32 4, %v280_v2  ;;  %v316_v13 = vsub.s32 5, %v280_v2  ;;  %v323_v16 = vsub.s32 6, %v280_v2  ;;  %v330_v17 = vsub.s32 7, %v280_v2 }
  0x56   : > { %v282_v8 = vrot.slane %v277_v3, %v281_v4  ;;  %v296_v9 = vrot.slane %v277_v3, %v295_v5  ;;  %v289_v10 = vrot.slane %v277_v3, %v288_v6  ;;  %v303_v11 = vrot.slane %v277_v3, %v302_v7 }
  0x57   : > { %v310_v14 = vrot.slane %v277_v3, %v309_v12  ;;  %v317_v15 = vrot.slane %v277_v3, %v316_v13  ;;  %v324_v18 = vrot.slane %v277_v3, %v323_v16  ;;  %v331_v19 = vrot.slane %v277_v3, %v330_v17 }
  0x58   : > { %284 = vbcast.lane.b32.xlu0 %v282_v8, 256  ;;  %298 = vbcast.lane.b32.xlu1 %v296_v9, 256 }
  0x5c   : > { %291 = vbcast.lane.b32.xlu0 %v289_v10, 256  ;;  %305 = vbcast.lane.b32.xlu1 %v303_v11, 256 }
  0x60   : > { %312 = vbcast.lane.b32.xlu0 %v310_v14, 256  ;;  %319 = vbcast.lane.b32.xlu1 %v317_v15, 256 }
  0x64   : > { %326 = vbcast.lane.b32.xlu0 %v324_v18, 256  ;;  %333 = vbcast.lane.b32.xlu1 %v331_v19, 256 }
  0x68   : > { %360 = vperm.xlu0 (!%p515_p7), %628, %v357_v53  }
  0xca   : > { %v285_v20 = vpop.permute.xlu0 %284  ;;  %v299_v21 = vpop.permute.xlu1 %298 }
  0xcb   : > { %v335_v28 = vmul.f32 %v285_v20, %v269_v22  ;;  %v337_v31 = vmul.f32 %v299_v21, %v271_v24 }
  0xce   : > { %v292_v25 = vpop.permute.xlu0 %291  ;;  %v306_v26 = vpop.permute.xlu1 %305 }
  0xcf   : > { %v336_v29 = vmul.f32 %v292_v25, %v270_v23  ;;  %v338_v33 = vmul.f32 %v306_v26, %v272_v27 }
  0xd1   : > { %v343_v32 = vadd.f32 %v336_v29, %v335_v28 }
  0xd2   : > { %v313_v34 = vpop.permute.xlu0 %312  ;;  %v320_v35 = vpop.permute.xlu1 %319 }
  0xd3   : > { %v344_v37 = vadd.f32 %v343_v32, %v337_v31  ;;  %v339_v38 = vmul.f32 %v313_v34, %v273_v30  ;;  %v340_v41 = vmul.f32 %v320_v35, %v274_v36 }
  0xd5   : > { %v345_v40 = vadd.f32 %v344_v37, %v338_v33 }
  0xd6   : > { %v327_v42 = vpop.permute.xlu0 %326  ;;  %v334_v43 = vpop.permute.xlu1 %333 }
  0xd7   : > { %v346_v45 = vadd.f32 %v345_v40, %v339_v38  ;;  %v341_v46 = vmul.f32 %v327_v42, %v275_v39  ;;  %v342_v48 = vmul.f32 %v334_v43, %v276_v44 }
  0xd9   : > { %v347_v47 = vadd.f32 %v346_v45, %v340_v41 }
  0xdb   : > { %v348_v49 = vadd.f32 %v347_v47, %v341_v46  ;;  %355 = sbr.rel (%p515_p7) target bundleno = 236 (0xec), region = 44 }
  0xdd   : > { %v349_v51 = vadd.f32 %v348_v49, %v342_v48 }
  0xdf   : > { %v350_v52 = vadd.f32 %v349_v51, %v278_v50 }
  0xe1   : > { %351 = vst [vmem:[#allocation2] sm:$0xff] %v350_v52 }
  0xe7   : > { %v361_v56 = vpop.permute.xlu0 %360 }
  0xe8   : > { %v356_v55 = vld [vmem:[#allocation2] sm:$0xff] }
  0xe9   : > { %v363_v57 = vmul.f32 %v361_v56, %v356_v55 }
  0xeb   : > { %364 = vst [vmem:[%s251_s28] sm:$0xff] %v363_v57 }
  0xec PF: > { %s517_s18 = sshll.u32 %s769_s19, 7  ;;  %s381_s24 = sshll.u32 %s251_s28, 4  ;;  %s382_s24 = int_to_ptr.vmem [resolvable:$true] %s381_s24 }
  0xed   : > { %s992_s25 = scalar_lea.hbm %s1055_s3, %s517_s18  ;;  %s366_s15 = scalar_lea.sflag [#allocation5], %s249_s6 }
  0xee   : > { %s659_s26 = scalar_lea.vmem %s382_s24, 128  ;;  %p1066_p0 = scmp.ne.s32.totalorder %s1063_s7, 0 }
  0xef   : > { %p660_p4 = scmp.ne.s32.totalorder %s382_s24, %s659_s26  ;;  %s789_s23 = smov [#allocation6]  }
  0xf0   : > { %s663_s29 = sshll.u32 %s789_s23, 4  ;;  %s664_s29 = int_to_ptr.vmem [resolvable:$false] %s663_s29 }
  0xf1   : > { %p661_p1 = pnand %p660_p4, %p1066_p0  ;;  %s665_s4 = scalar_lea.vmem %s664_s29, 256 }
  0xf2   : > { %p666_p8 = scmp.lt.s32.totalorder %s382_s24, %s664_s29  ;;  %p667_p3 = scmp.lt.s32.totalorder %s665_s4, %s659_s26 }
  0xf3   : > { %p662_p5 = pneg %p661_p1 }
  0xf4   : > { %p668_p10 = por %p667_p3, %p666_p8 }
  0xf6   : > { %p669_p11 = pnand %p668_p10, %p662_p5 }
  0xf8   : > { %672 = shalt.err (!%p669_p11)
}
  0xf9   : > { %s673_s19 = scalar_lea.hbm %s992_s25, 128  ;;  %s677_s28 = scalar_lea.hbm %s1055_s3, 256 }
  0xfa   : > { %p674_p6 = scmp.ne.s32.totalorder %s992_s25, %s673_s19  ;;  %p678_p12 = scmp.lt.u32.totalorder %s992_s25, %s1055_s3 }
  0xfb   : > { %p679_p2 = scmp.lt.u32.totalorder %s677_s28, %s673_s19  ;;  %p681_p4 = scmp.lt.u32.totalorder %s673_s19, %s992_s25 }
  0xfc   : > { %p675_p9 = pnand %p674_p6, %p1066_p0 }
  0xfd   : > { %p680_p7 = por %p679_p2, %p678_p12 }
  0xfe   : > { %p676_p13 = pneg %p675_p9 }
  0xff   : > { %p682_p1 = por %p681_p4, %p680_p7 }
 0x101   : > { %p683_p5 = pnand %p682_p1, %p676_p13 }
 0x103   : > { %686 = shalt.err (!%p683_p5)
}
 0x104   : > { %523 = dma.vmem_to_hbm [thread:$0]  (%p1066_p0), %s382_s24, 128, %s992_s25, %s366_s15  }
 0x105 PF: > { %p534_p8 = scmp.ge.s32.totalorder %s781_s22, 2  ;;  %s393_s11 = sand.u32 1, %s741_s12  }
 0x106   : > { %p1067_p3 = scmp.ne.s32.totalorder %s1064_s10, 0  ;;  %s394_s30 = scalar_lea.sflag [#allocation5], %s393_s11 }
 0x108   : > { %p530_p10 = pnand %p534_p8, %p1067_p3 }
 0x10a   : > { %736 = dma.done.wait (!%p530_p10), %s394_s30, 128  }
 0x10b   : > { %738 = vsyncadd (!%p530_p10), %s394_s30, 4294967168  ;;  %s19_s22 = sadd.s32 1, %s781_s22   ;;  %s1068_s7 = sld [smem:[#allocation9_spill]] }
 0x10c   : > { %p16_p11 = scmp.ge.s32.totalorder %s19_s22, 6   ;;  %s1069_s25 = sld [smem:[#allocation10_spill]] }
 0x10d   : > { %s1070_s12 = smov %s745_s13  ;;  %s1071_s13 = smov %s749_s14 }
 0x10e   : > { %s1072_s14 = smov %s897_s8  ;;  %s1073_s15 = smov %s757_s16 }
 0x10f   : > { %s1074_s16 = smov %s761_s17  ;;  %s1075_s17 = smov %s900_s9 }
 0x110   : > { %s1076_s18 = smov %s773_s20  ;;  %s1077_s19 = smov %s777_s21 }
 0x111   : > { %s1078_s20 = smov %s1068_s7  ;;  %18 = sbr.rel (!%p16_p11) target bundleno = 9 (0x9), region = 91 }
 0x112   : > { %s1079_s21 = smov %s1069_s25 }
 0x118   :  { %399 = vsyncpa [#allocation4], 1 }
 0x119   :  { %401 = vsyncpa [#allocation4 + $0x1], 1 }
 0x11a   :  { %402 = vsyncpa [#allocation5], 1 }
 0x11b   :  { %404 = vsyncpa [#allocation5 + $0x1], 1 }

</bundles_post_ra>
